<compile_context>
chip_gen: v7x
topology: tpu7x:2x2x1
jax: 0.10.0
libtpu: 0.0.40
codegen_flags: <defaults>
</compile_context>

<pallas_src>
import jax
import jax.numpy as jnp
from jax.experimental import pallas as pl
from jax.experimental.pallas import tpu as pltpu


def _round_up(x: int, m: int) -> int:
    return ((x + m - 1) // m) * m


# Conservative VMEM working-set budget that is safe on v5e/v6e/v7x, plus the
# scoped limit we request from the compiler (default is 16 MiB on v5e).
_VMEM_WORKING_SET_BUDGET = 20 * 1024 * 1024
_VMEM_LIMIT_BYTES = 32 * 1024 * 1024
_MIN_M_TILES_WHEN_LARGE = 4          # >= 2 tiles per TensorCore on v7x

# Below this many MACs, Pallas launch overhead dominates -> plain XLA.
_MIN_PALLAS_WORK = 1 << 20


def _linear_kernel(x_ref, w_ref, b_ref, o_ref):
    # x_ref: (tm, K)   activations tile (batch-tiled over the grid)
    # w_ref: (K, N)    weight, already (in, out) layout; VMEM-resident
    # b_ref: (1, N)    bias row; VMEM-resident
    # o_ref: (tm, N)   output tile
    acc = jnp.dot(x_ref[...], w_ref[...], preferred_element_type=jnp.float32)
    # Bias added exactly once, in the store epilogue.
    o_ref[...] = (acc + b_ref[...]).astype(o_ref.dtype)


def _choose_tm(M: int, K: int, N: int, itemsize: int) -> int:
    """Batch tile size from a VMEM budget; multiple of 8 unless it equals M."""
    resident = (K * N + N) * itemsize            # weight + bias, live all grid
    per_row = 2 * (K + N) * itemsize             # double-buffered x + out rows
    tm_budget = max(8, ((_VMEM_WORKING_SET_BUDGET - resident) // per_row) // 8 * 8)
    # For large batches keep >= _MIN_M_TILES_WHEN_LARGE grid steps (megacore),
    # but never shrink tiles below 256 rows just to manufacture tiles.
    tm_core_cap = max(256, _round_up(pl.cdiv(M, _MIN_M_TILES_WHEN_LARGE), 8))
    tm = min(tm_budget, tm_core_cap)
    if tm >= M:
        tm = M                                   # single block == full batch dim
    return tm


def _linear_pallas(x, weight, bias):
    """Pallas path. x: (M, K), weight: (N, K) [PyTorch layout], bias: (N,)."""
    M, K = x.shape
    N = weight.shape[0]

    # One-time tiny transpose of the (out, in) weight to (in, out) so the
    # kernel runs a plain NN matmul (no per-tile weight transpose in the XLU).
    w_t = weight.T                     # (K, N)
    b_row = bias.reshape(1, N)

    itemsize = jnp.dtype(x.dtype).itemsize
    tm = _choose_tm(M, K, N, itemsize)
    grid = (pl.cdiv(M, tm),)           # ragged last tile handled by Pallas

    cost = pl.CostEstimate(
        flops=2 * M * N * K,
        transcendentals=0,
        bytes_accessed=(M * K + K * N + N + M * N) * itemsize,
    )

    return pl.pallas_call(
        _linear_kernel,
        out_shape=jax.ShapeDtypeStruct((M, N), x.dtype),
        grid_spec=pltpu.PrefetchScalarGridSpec(
            num_scalar_prefetch=0,
            grid=grid,
            in_specs=[
                # x: tiled over the batch axis; K block == full array dim.
                pl.BlockSpec((tm, K), lambda i: (i, 0)),
                # weight: full array, VMEM-resident across the whole grid.
                pl.BlockSpec((K, N), lambda i: (0, 0)),
                # bias: full row, VMEM-resident across the whole grid.
                pl.BlockSpec((1, N), lambda i: (0, 0)),
            ],
            out_specs=pl.BlockSpec((tm, N), lambda i: (i, 0)),
        ),
        compiler_params=pltpu.CompilerParams(
            # M tiles are independent -> shard across TensorCores on v7x.
            dimension_semantics=("parallel",),
            vmem_limit_bytes=_VMEM_LIMIT_BYTES,
        ),
        cost_estimate=cost,
    )(x, w_t, b_row)


def linear_forward(x, weight, bias, *, force_pallas: bool = False):
    """y = x @ weight.T + bias   (PyTorch nn.Linear semantics).

    x:      (M, K) float32
    weight: (N, K) float32   (PyTorch layout [out_features, in_features])
    bias:   (N,)   float32
    returns (M, N) float32
    """
    M, K = x.shape
    N = weight.shape[0]
    if not force_pallas and (M * N * K) < _MIN_PALLAS_WORK:
        # Toy sizes: the whole problem is a few KB; skip the custom call.
        return x @ weight.T + bias
    return _linear_pallas(x, weight, bias)


if __name__ == "__main__":
    # Small shapes implied by LinearRegressionModel(input_dim, output_dim).
    batch, input_dim, output_dim = 8, 32, 16

    key = jax.random.PRNGKey(0)
    kx, kw, kb, kx2 = jax.random.split(key, 4)

    x = jax.random.normal(kx, (batch, input_dim), dtype=jnp.float32)
    # Deterministic parameter init (uniform like PyTorch's default, fixed seed).
    bound = 1.0 / (input_dim ** 0.5)
    weight = jax.random.uniform(kw, (output_dim, input_dim),
                                minval=-bound, maxval=bound, dtype=jnp.float32)
    bias = jax.random.uniform(kb, (output_dim,),
                              minval=-bound, maxval=bound, dtype=jnp.float32)

    # 1) Toy shape (single tile). Force the Pallas path so the kernel runs.
    out = jax.block_until_ready(linear_forward(x, weight, bias, force_pallas=True))
    ref = x @ weight.T + bias
    assert out.shape == (batch, output_dim)
    assert jnp.allclose(out, ref, atol=1e-5, rtol=1e-5)

    # 2) Multi-tile + ragged-M path (grid > 1, M not a multiple of tm).
    M2 = 1000
    x2 = jax.random.normal(kx2, (M2, input_dim), dtype=jnp.float32)
    out2 = jax.block_until_ready(linear_forward(x2, weight, bias, force_pallas=True))
    ref2 = x2 @ weight.T + bias
    assert out2.shape == (M2, output_dim)
    assert jnp.allclose(out2, ref2, atol=1e-4, rtol=1e-4)

    print("KERNEL_OK")
</pallas_src>

<mosaic_0001>
module attributes {stable_mosaic.version = 11 : i64} {
  func.func @_linear_kernel(%arg0: i32, %arg1: memref<8x32xf32, #tpu.memory_space<vmem>>, %arg2: memref<32x16xf32, #tpu.memory_space<vmem>>, %arg3: memref<1x16xf32, #tpu.memory_space<vmem>>, %arg4: memref<8x16xf32, #tpu.memory_space<vmem>>) attributes {dimension_semantics = [#tpu.dimension_semantics<parallel>], iteration_bounds = array<i64: 1>, scalar_prefetch = 0 : i64, scratch_operands = 0 : i64, tpu.core_type = #tpu.core_type<tc>, window_params = [{transform_indices = @transform_0, window_bounds = array<i64: 8, 32>}, {pipeline_mode = #tpu.pipeline_mode<synchronous>, transform_indices = @transform_1, window_bounds = array<i64: 32, 16>}, {pipeline_mode = #tpu.pipeline_mode<synchronous>, transform_indices = @transform_2, window_bounds = array<i64: 1, 16>}, {transform_indices = @transform_3, window_bounds = array<i64: 8, 16>}]} {
    %c0 = arith.constant 0 : index
    %c0_0 = arith.constant 0 : index
    %0 = vector.load %arg1[%c0, %c0_0] : memref<8x32xf32, #tpu.memory_space<vmem>>, vector<8x32xf32>
    %c0_1 = arith.constant 0 : index
    %c0_2 = arith.constant 0 : index
    %1 = vector.load %arg2[%c0_1, %c0_2] : memref<32x16xf32, #tpu.memory_space<vmem>>, vector<32x16xf32>
    %cst = arith.constant dense<0.000000e+00> : vector<8x16xf32>
    %2 = tpu.matmul %0, %1, %cst {dimension_numbers = #tpu.dot_dimension_numbers<[1], [0], [0], [1], [0, 0, 1, 1], [], []>} : vector<8x32xf32>, vector<32x16xf32>, vector<8x16xf32> -> vector<8x16xf32>
    %c0_3 = arith.constant 0 : index
    %c0_4 = arith.constant 0 : index
    %3 = vector.load %arg3[%c0_3, %c0_4] : memref<1x16xf32, #tpu.memory_space<vmem>>, vector<1x16xf32>
    %4 = vector.broadcast %3 : vector<1x16xf32> to vector<8x16xf32>
    %5 = arith.addf %2, %4 : vector<8x16xf32>
    %c0_5 = arith.constant 0 : index
    %c0_6 = arith.constant 0 : index
    %6 = vector.load %arg4[%c0_5, %c0_6] : memref<8x16xf32, #tpu.memory_space<vmem>>, vector<8x16xf32>
    tpu.vector_store %arg4[%c0_5, %c0_6], %5 {strides = array<i32>} : memref<8x16xf32, #tpu.memory_space<vmem>>, vector<8x16xf32>,
    return
  }
  func.func @transform_0(%arg0: i32) -> (i32, i32) {
    %c0_i32 = arith.constant 0 : i32
    %c0_i32_0 = arith.constant 0 : i32
    return %arg0, %c0_i32 : i32, i32
  }
  func.func @transform_1(%arg0: i32) -> (i32, i32) {
    %c0_i32 = arith.constant 0 : i32
    %c0_i32_0 = arith.constant 0 : i32
    %c0_i32_1 = arith.constant 0 : i32
    return %c0_i32, %c0_i32_0 : i32, i32
  }
  func.func @transform_2(%arg0: i32) -> (i32, i32) {
    %c0_i32 = arith.constant 0 : i32
    %c0_i32_0 = arith.constant 0 : i32
    %c0_i32_1 = arith.constant 0 : i32
    return %c0_i32, %c0_i32_0 : i32, i32
  }
  func.func @transform_3(%arg0: i32) -> (i32, i32) {
    %c0_i32 = arith.constant 0 : i32
    %c0_i32_0 = arith.constant 0 : i32
    return %arg0, %c0_i32 : i32, i32
  }
}

</mosaic_0001>

<bundles_post_ra>
// kernel: tpu_custom_call.1
= control target key start
LH: loop header
LB: loop body
LE: loop exit
PB: predicated region body
PF: predicated region fallthrough
CT: control target
= control target key end

     0   :  { %v169_v3 = vmov 0.0|0.0   ;;  %vm170_vm0 = vmmov 0   ;;  %v171_v6 = vmov 0.0   ;;  %s223_s0 = inlined_call_operand.vmem [shape: f32[8,32], index: 0, kind: input, shape index: {}]   ;;  %s224_s1 = inlined_call_operand.vmem [shape: f32[32,16], index: 1, kind: input, shape index: {}]   ;;  %s225_s2 = inlined_call_operand.vmem [shape: f32[1,16], index: 2, kind: input, shape index: {}]   ;;  %s226_s3 = inlined_call_operand.hbm [shape: f32[8,16], index: 3, kind: output, shape index: {}]  }
   0x1   :  { %v16_v0 = vld [vmem:[%s224_s1] sm:$0xff]  ;;  %v17_v1 = vld [vmem:[%s224_s1 + $0x8] sm:$0xff]  ;;  %v18_v2 = vld [vmem:[%s224_s1 + $0x10] sm:$0xff]  ;;  %135 = vmatprep.subr.bf16.mxu0 %v169_v3  ;;  %132 = vmatprep.mubr.msk.f32.mxu0 %vm170_vm0, %v171_v6 }
   0x2   :  { %v136_v4 = vpack.c.bf16 %v17_v1, %v16_v0  ;;  %v19_v5 = vld [vmem:[%s224_s1 + $0x18] sm:$0xff] }
   0x3   :  { %8 = vsyncpa [#allocation3], 0  ;;  %v139_v7 = vpack.c.bf16 %v19_v5, %v18_v2  ;;  %v15_v8 = vld [vmem:[%s223_s0] sm:$0xff]  ;;  %vm27_vm1 = vcmask 261120   ;;  %s172_s24 = smov [#allocation2]   ;;  %vm101_vm2 = vcmask 130048  }
   0x4   :  { %137 = vmatpush3.bf16.msra.mxu0 %v136_v4  ;;  %v117_v9 = vld [vmem:[%s225_s2] ss:$0 sm:$0xff]  ;;  %s109_s1 = sshll.u32 %s172_s24, 4  ;;  %s110_s1 = int_to_ptr.vmem [resolvable:$true] %s109_s1 }
   0x5   :  { %138 = vmatprep.subr.bf16.mxu0 %v169_v3  ;;  %s145_s25 = scalar_lea.vmem %s110_s1, 128  ;;  %p150_p1 = scmp.lt.s32.totalorder %s110_s1, %s110_s1 }
   0x6   :  { %p146_p0 = scmp.ne.s32.totalorder %s110_s1, %s145_s25  ;;  %p151_p2 = scmp.lt.s32.totalorder %s145_s25, %s145_s25 }
   0x8   :  { %140 = vmatpush3.bf16.msra.mxu0 %v139_v7  ;;  %p152_p3 = por %p151_p2, %p150_p1 }
   0xa   :  { %p153_p4 = pnand %p152_p3, %p146_p0 }
   0xb   :  { %133 = vmatmul.mubr.msk.f32.vlgmr.msra.gmra.mrb[0].mxu0 %vm27_vm1, %v15_v8 }
  0xde   :  { %v97_v10 = vpop.f32.mrb[0].mxu0 }
  0xdf   :  { %v98_v11 = vadd.f32 %v117_v9, %v97_v10  ;;  %v134_v12 = vpop.f32.mrb[1].mxu0 }
  0xe1   :  { %102 = vst.msk [vmem:[#allocation2] sm:$0xff] %vm101_vm2, %v98_v11 }
  0xe2   :  { %156 = shalt.err (!%p153_p4)
}
  0xe3   :  { %s157_s27 = scalar_lea.hbm %s226_s3, 128 }
  0xe4   :  { %p158_p5 = scmp.ne.s32.totalorder %s226_s3, %s157_s27  ;;  %p161_p6 = scmp.lt.u32.totalorder %s157_s27, %s226_s3 }
  0xe6   :  { %p163_p7 = pnand %p161_p6, %p158_p5 }
  0xe8   :  { %166 = shalt.err (!%p163_p7)
}
  0xe9   :  { %112 = dma.vmem_to_hbm [thread:$0]  %s110_s1, 128, %s226_s3, [#allocation3]  }
  0xea   :  { %167 = dma.done.wait [#allocation3], 128  }
  0xeb   :  { %168 = vsyncadd [#allocation3], 4294967168 }
  0xec   :  { %116 = vsyncpa [#allocation3], 1 }

</bundles_post_ra>
